<compile_context>
chip_gen: v7x
topology: tpu7x:2x2x1
jax: 0.10.0
libtpu: 0.0.40
codegen_flags: <defaults>
</compile_context>

<pallas_src>
import functools

import jax
import jax.numpy as jnp
from jax.experimental import pallas as pl
from jax.experimental.pallas import tpu as pltpu


def _round_up(x, m):
    return (x + m - 1) // m * m


def _cdiv(a, b):
    return -(-a // b)


def _vmem_capacity_bytes():
    """Physical VMEM of the current generation (conservative fallback)."""
    try:
        info = pltpu.get_tpu_info()
        cap = int(getattr(info, "vmem_capacity_bytes", 0) or 0)
        if cap > 0:
            return cap
    except Exception:
        pass
    return 64 * 1024 * 1024  # v7x-sized fallback: safe everywhere


def _masked_diffs(x1_ref, x2_ref, tile_idx, *, w, l, l_pad, m, tm,
                  need_row_mask, need_lane_mask):
    """Upcast, zero out-of-bounds rows/lanes, return the four forward diffs.

    Differences are computed with lane rotations (XLU); seam / wraparound
    positions are removed later by the (1, L) seam masks.
    """
    x1 = x1_ref[...].astype(jnp.float32)
    x2 = x2_ref[...].astype(jnp.float32)
    if need_row_mask or need_lane_mask:
        ok = None
        if need_row_mask:
            row = jax.lax.broadcasted_iota(jnp.int32, (tm, l_pad), 0)
            ok = (row + tile_idx * tm) < m
        if need_lane_mask:
            col = jax.lax.broadcasted_iota(jnp.int32, (tm, l_pad), 1)
            lane_ok = col < l
            ok = lane_ok if ok is None else jnp.logical_and(ok, lane_ok)
        x1 = jnp.where(ok, x1, 0.0)   # NaN-safe: OOB block contents are garbage
        x2 = jnp.where(ok, x2, 0.0)
    # out[j] = x[(j + k) % l_pad] - x[j]
    dx1 = pltpu.roll(x1, l_pad - w, axis=1) - x1   # H-direction forward diff
    dy1 = pltpu.roll(x1, l_pad - 1, axis=1) - x1   # W-direction forward diff
    dx2 = pltpu.roll(x2, l_pad - w, axis=1) - x2
    dy2 = pltpu.roll(x2, l_pad - 1, axis=1) - x2
    return dx1, dy1, dx2, dy2


# ---------------------------------------------------------------------------
# Path 1: whole level resident in VMEM, single two-phase call, grid = (2,)
# ---------------------------------------------------------------------------
def _resident_level_kernel(x1_ref, x2_ref, mx_ref, my_ref, out_ref, acc_ref, *,
                           h, w, l, l_pad, m, tm, need_row_mask, need_lane_mask):
    phase = pl.program_id(0)
    dx1, dy1, dx2, dy2 = _masked_diffs(
        x1_ref, x2_ref, 0, w=w, l=l, l_pad=l_pad, m=m, tm=tm,
        need_row_mask=need_row_mask, need_lane_mask=need_lane_mask)
    mx = mx_ref[...]          # (1, l_pad) 0/1 seam masks (implicit broadcast)
    my = my_ref[...]

    @pl.when(phase == 0)
    def _phase0():
        # Sublane-reduce first so the seam mask multiplies a (1, L) vector only.
        acc_ref[0] = jnp.sum(jnp.sum(jnp.abs(dx1), axis=0, keepdims=True) * mx)
        acc_ref[1] = jnp.sum(jnp.sum(jnp.abs(dx2), axis=0, keepdims=True) * mx)
        acc_ref[2] = jnp.sum(jnp.sum(jnp.abs(dy1), axis=0, keepdims=True) * my)
        acc_ref[3] = jnp.sum(jnp.sum(jnp.abs(dy2), axis=0, keepdims=True) * my)

    @pl.when(phase == 1)
    def _phase1():
        alphax = 2.0 * acc_ref[0] / acc_ref[1]
        alphay = 2.0 * acc_ref[2] / acc_ref[3]
        # 2*sigmoid(v) - 1 == tanh(v/2); 0.5 rides on the tanh argument / the
        # alpha scalar, and the seam mask only needs to hit one factor.
        px = jnp.tanh(dx1 * 0.5) * mx
        py = jnp.tanh(dy1 * 0.5) * my
        qx = jnp.tanh(dx2 * (0.5 * alphax))
        qy = jnp.tanh(dy2 * (0.5 * alphay))
        inv_cx = 1.0 / float(m * (h - 1) * w)   # true element counts
        inv_cy = 1.0 / float(m * h * (w - 1))
        out_ref[0] = jnp.sqrt(jnp.sqrt(jnp.sum((px * px) * (qx * qx)) * inv_cx))
        out_ref[1] = jnp.sqrt(jnp.sqrt(jnp.sum((py * py) * (qy * qy)) * inv_cy))


# ---------------------------------------------------------------------------
# Path 2: large level, two "parallel" passes emitting per-tile partial sums
# ---------------------------------------------------------------------------
def _grad_abs_kernel(x1_ref, x2_ref, mx_ref, my_ref,
                     o_gx1_ref, o_gx2_ref, o_gy1_ref, o_gy2_ref, *,
                     w, l, l_pad, m, tm, need_row_mask, need_lane_mask):
    t = pl.program_id(0)
    dx1, dy1, dx2, dy2 = _masked_diffs(
        x1_ref, x2_ref, t, w=w, l=l, l_pad=l_pad, m=m, tm=tm,
        need_row_mask=need_row_mask, need_lane_mask=need_lane_mask)
    mx = mx_ref[...]
    my = my_ref[...]
    s_gx1 = jnp.sum(jnp.sum(jnp.abs(dx1), axis=0, keepdims=True) * mx)
    s_gx2 = jnp.sum(jnp.sum(jnp.abs(dx2), axis=0, keepdims=True) * mx)
    s_gy1 = jnp.sum(jnp.sum(jnp.abs(dy1), axis=0, keepdims=True) * my)
    s_gy2 = jnp.sum(jnp.sum(jnp.abs(dy2), axis=0, keepdims=True) * my)
    # Per-tile partials broadcast to lane-dense (1, 8, 128) blocks so the store
    # is a plain unmasked VMEM write and each grid point owns its own block
    # (tile axis may run "parallel" on v7x's two TensorCores).
    o_gx1_ref[...] = jnp.full(o_gx1_ref.shape, s_gx1, jnp.float32)
    o_gx2_ref[...] = jnp.full(o_gx2_ref.shape, s_gx2, jnp.float32)
    o_gy1_ref[...] = jnp.full(o_gy1_ref.shape, s_gy1, jnp.float32)
    o_gy2_ref[...] = jnp.full(o_gy2_ref.shape, s_gy2, jnp.float32)


def _tanh_prod_kernel(alpha_ref, x1_ref, x2_ref, mx_ref, my_ref,
                      o_x_ref, o_y_ref, *,
                      w, l, l_pad, m, tm, need_row_mask, need_lane_mask):
    t = pl.program_id(0)
    dx1, dy1, dx2, dy2 = _masked_diffs(
        x1_ref, x2_ref, t, w=w, l=l, l_pad=l_pad, m=m, tm=tm,
        need_row_mask=need_row_mask, need_lane_mask=need_lane_mask)
    mx = mx_ref[...]
    my = my_ref[...]
    alphax = alpha_ref[0]     # (2,) f32 in SMEM
    alphay = alpha_ref[1]
    px = jnp.tanh(dx1 * 0.5) * mx
    py = jnp.tanh(dy1 * 0.5) * my
    qx = jnp.tanh(dx2 * (0.5 * alphax))
    qy = jnp.tanh(dy2 * (0.5 * alphay))
    s_x = jnp.sum((px * px) * (qx * qx))
    s_y = jnp.sum((py * py) * (qy * qy))
    o_x_ref[...] = jnp.full(o_x_ref.shape, s_x, jnp.float32)
    o_y_ref[...] = jnp.full(o_y_ref.shape, s_y, jnp.float32)


# ---------------------------------------------------------------------------
# One pyramid level
# ---------------------------------------------------------------------------
def _exclusion_level(img1, img2, tile_budget_bytes=None):
    """Returns (2,) f32 [gradx_loss_level, grady_loss_level]."""
    n, c, h, w = img1.shape
    m = n * c
    l = h * w
    l_pad = _round_up(l, 128)

    x1 = img1.reshape(m, l)
    x2 = img2.reshape(m, l)

    # Seam masks: 1 where the forward difference is valid, 0 at the H-seam /
    # W-seam / lane padding.  Tiny, built once in XLA, resident in VMEM.
    col = jnp.arange(l_pad, dtype=jnp.int32)[None, :]
    mask_x = (col < (h - 1) * w).astype(jnp.float32)
    mask_y = ((col % w != (w - 1)) & (col < l)).astype(jnp.float32)

    # Generation-aware VMEM budget (~48 MiB scoped on v7x, ~96 MiB on v5e/v6e).
    vmem_cap = _vmem_capacity_bytes()
    vmem_limit = min(max((vmem_cap * 3) // 4, 32 * 1024 * 1024),
                     112 * 1024 * 1024)
    budget = vmem_limit if tile_budget_bytes is None else int(tile_budget_bytes)

    # Working set per row-tile ~ 12x the f32 tile (inputs x double buffers +
    # upcasts + four difference tensors + temporaries).
    row_bytes = l_pad * 4
    max_rows = max(8, ((budget // 12) // row_bytes) // 8 * 8)
    # TODO(synk): tile the lane dimension (with a W-shift halo) so one row of a
    # very large frame (H*W*4 > budget/12) does not blow the VMEM budget.

    m8 = _round_up(m, 8)
    need_lane_mask = l_pad != l
    cnt_x = float(m * (h - 1) * w)
    cnt_y = float(m * h * (w - 1))
    itemsize = jnp.dtype(img1.dtype).itemsize

    if m8 <= max_rows:
        # ---------- whole level fits: single two-phase call, block resident --
        tm = m8
        need_row_mask = (m % tm) != 0
        kernel = functools.partial(
            _resident_level_kernel, h=h, w=w, l=l, l_pad=l_pad, m=m, tm=tm,
            need_row_mask=need_row_mask, need_lane_mask=need_lane_mask)
        return pl.pallas_call(
            kernel,
            out_shape=jax.ShapeDtypeStruct((2,), jnp.float32),
            grid_spec=pltpu.PrefetchScalarGridSpec(
                num_scalar_prefetch=0,
                grid=(2,),                       # (phase,); constant block
                in_specs=[                       # index -> image DMA'd once
                    pl.BlockSpec((tm, l_pad), lambda p: (0, 0)),
                    pl.BlockSpec((tm, l_pad), lambda p: (0, 0)),
                    pl.BlockSpec((1, l_pad), lambda p: (0, 0)),
                    pl.BlockSpec((1, l_pad), lambda p: (0, 0)),
                ],
                out_specs=pl.BlockSpec((2,), lambda p: (0,),
                                       memory_space=pltpu.MemorySpace.SMEM),
                scratch_shapes=[pltpu.SMEM((4,), jnp.float32)],
            ),
            compiler_params=pltpu.CompilerParams(
                dimension_semantics=("arbitrary",),   # phase 1 needs phase 0
                vmem_limit_bytes=vmem_limit),
            cost_estimate=pl.CostEstimate(
                flops=int(50 * m * l), transcendentals=int(4 * m * l),
                bytes_accessed=int(2 * m * l * itemsize)),
        )(x1, x2, mask_x, mask_y)

    # ---------- large level: two passes, row-tile axis "parallel" ------------
    tm = max_rows
    nt = _cdiv(m, tm)
    need_row_mask = (m % tm) != 0

    x_spec = pl.BlockSpec((tm, l_pad), lambda t: (t, 0))
    m_spec = pl.BlockSpec((1, l_pad), lambda t: (0, 0))
    p_spec = pl.BlockSpec((1, 8, 128), lambda t: (t, 0, 0))
    p_shape = jax.ShapeDtypeStruct((nt, 8, 128), jnp.float32)
    parallel = pltpu.CompilerParams(
        dimension_semantics=("parallel",), vmem_limit_bytes=vmem_limit)
    common = dict(w=w, l=l, l_pad=l_pad, m=m, tm=tm,
                  need_row_mask=need_row_mask, need_lane_mask=need_lane_mask)

    # Pass A: per-tile partial sum|grad| terms.
    g1, g2, g3, g4 = pl.pallas_call(
        functools.partial(_grad_abs_kernel, **common),
        out_shape=(p_shape,) * 4,
        grid_spec=pltpu.PrefetchScalarGridSpec(
            num_scalar_prefetch=0, grid=(nt,),
            in_specs=[x_spec, x_spec, m_spec, m_spec],
            out_specs=(p_spec,) * 4),
        compiler_params=parallel,
        cost_estimate=pl.CostEstimate(
            flops=int(20 * m * l), transcendentals=0,
            bytes_accessed=int(2 * m * l * itemsize)),
    )(x1, x2, mask_x, mask_y)

    alphax = 2.0 * jnp.sum(g1[:, 0, 0]) / jnp.sum(g2[:, 0, 0])
    alphay = 2.0 * jnp.sum(g3[:, 0, 0]) / jnp.sum(g4[:, 0, 0])
    alphas = jnp.stack([alphax, alphay]).astype(jnp.float32)

    # Pass B: per-tile partial tanh-product sums (alphas live in SMEM).
    p_x, p_y = pl.pallas_call(
        functools.partial(_tanh_prod_kernel, **common),
        out_shape=(p_shape,) * 2,
        grid_spec=pltpu.PrefetchScalarGridSpec(
            num_scalar_prefetch=0, grid=(nt,),
            in_specs=[pl.BlockSpec(memory_space=pltpu.MemorySpace.SMEM),
                      x_spec, x_spec, m_spec, m_spec],
            out_specs=(p_spec,) * 2),
        compiler_params=parallel,
        cost_estimate=pl.CostEstimate(
            flops=int(30 * m * l), transcendentals=int(4 * m * l),
            bytes_accessed=int(2 * m * l * itemsize)),
    )(alphas, x1, x2, mask_x, mask_y)

    loss_x = jnp.sqrt(jnp.sqrt(jnp.sum(p_x[:, 0, 0]) / cnt_x))
    loss_y = jnp.sqrt(jnp.sqrt(jnp.sum(p_y[:, 0, 0]) / cnt_y))
    return jnp.stack([loss_x, loss_y])


def _avg_pool_2x2(x):
    # AvgPool2d(kernel=2, stride=2), NCHW, floor behaviour for odd H/W.
    n, c, h, w = x.shape
    h2, w2 = h // 2, w // 2
    x = x[:, :, : h2 * 2, : w2 * 2]
    return x.reshape(n, c, h2, 2, w2, 2).mean(axis=(3, 5))


@functools.partial(jax.jit, static_argnames=("level", "tile_budget_bytes"))
def exclusion_loss(img1, img2, level=1, tile_budget_bytes=None):
    """JAX/Pallas equivalent of ExclusionLoss(level).forward(img1, img2)."""
    total_x = jnp.float32(0.0)
    total_y = jnp.float32(0.0)
    for lvl in range(level):
        gl = _exclusion_level(img1, img2, tile_budget_bytes)
        total_x = total_x + gl[0]
        total_y = total_y + gl[1]
        if lvl + 1 < level:               # pooled images after the last level
            img1 = _avg_pool_2x2(img1)    # are never used by the reference
            img2 = _avg_pool_2x2(img2)
    return total_x / (level * 3) + total_y / (level * 3)


def _exclusion_loss_ref(img1, img2, level=1):
    """Pure-JAX reference (mirrors the PyTorch module) for verification."""
    img1 = img1.astype(jnp.float32)
    img2 = img2.astype(jnp.float32)
    gradx_loss, grady_loss = [], []
    for _ in range(level):
        gx1 = img1[:, :, 1:, :] - img1[:, :, :-1, :]
        gy1 = img1[:, :, :, 1:] - img1[:, :, :, :-1]
        gx2 = img2[:, :, 1:, :] - img2[:, :, :-1, :]
        gy2 = img2[:, :, :, 1:] - img2[:, :, :, :-1]
        ax = 2.0 * jnp.mean(jnp.abs(gx1)) / jnp.mean(jnp.abs(gx2))
        ay = 2.0 * jnp.mean(jnp.abs(gy1)) / jnp.mean(jnp.abs(gy2))
        gx1_s = jax.nn.sigmoid(gx1) * 2 - 1
        gy1_s = jax.nn.sigmoid(gy1) * 2 - 1
        gx2_s = jax.nn.sigmoid(gx2 * ax) * 2 - 1
        gy2_s = jax.nn.sigmoid(gy2 * ay) * 2 - 1
        gradx_loss.append(jnp.mean(gx1_s ** 2 * gx2_s ** 2) ** 0.25)
        grady_loss.append(jnp.mean(gy1_s ** 2 * gy2_s ** 2) ** 0.25)
        img1 = _avg_pool_2x2(img1)
        img2 = _avg_pool_2x2(img2)
    return sum(gradx_loss) / (level * 3) + sum(grady_loss) / (level * 3)


if __name__ == "__main__":
    key = jax.random.PRNGKey(0)
    k1, k2, k3, k4 = jax.random.split(key, 4)

    # Small NCHW inputs consistent with the module's forward.
    img1 = jax.random.normal(k1, (2, 4, 16, 16), dtype=jnp.float32)
    img2 = jax.random.normal(k2, (2, 4, 16, 16), dtype=jnp.float32)

    # Resident single-call path; level=3 also exercises the unaligned-lane
    # (H*W not a multiple of 128) masking on the pooled 8x8 / 4x4 levels.
    for level in (1, 3):
        out = jax.block_until_ready(exclusion_loss(img1, img2, level=level))
        ref = jax.block_until_ready(_exclusion_loss_ref(img1, img2, level=level))
        assert jnp.allclose(out, ref, rtol=1e-5, atol=1e-5), (level, out, ref)

    # Force the multi-tile two-pass ("parallel" row-tile) path with a tiny tile
    # budget and a partial last row tile (N*C = 10 rows, tile = 8 rows).
    img3 = jax.random.normal(k3, (2, 5, 16, 16), dtype=jnp.float32)
    img4 = jax.random.normal(k4, (2, 5, 16, 16), dtype=jnp.float32)
    out = jax.block_until_ready(
        exclusion_loss(img3, img4, level=1, tile_budget_bytes=4096))
    ref = jax.block_until_ready(_exclusion_loss_ref(img3, img4, level=1))
    assert jnp.allclose(out, ref, rtol=1e-5, atol=1e-5), (out, ref)

    print("KERNEL_OK")
</pallas_src>

<mosaic_0001>
module attributes {stable_mosaic.version = 11 : i64} {
  func.func @_resident_level_kernel(%arg0: i32, %arg1: memref<8x256xf32, #tpu.memory_space<vmem>>, %arg2: memref<8x256xf32, #tpu.memory_space<vmem>>, %arg3: memref<1x256xf32, #tpu.memory_space<vmem>>, %arg4: memref<1x256xf32, #tpu.memory_space<vmem>>, %arg5: memref<2xf32, #tpu.memory_space<smem>>, %arg6: memref<4xf32, #tpu.memory_space<smem>>) attributes {dimension_semantics = [#tpu.dimension_semantics<arbitrary>], iteration_bounds = array<i64: 2>, scalar_prefetch = 0 : i64, scratch_operands = 1 : i64, tpu.core_type = #tpu.core_type<tc>, window_params = [{pipeline_mode = #tpu.pipeline_mode<synchronous>, transform_indices = @transform_0, window_bounds = array<i64: 8, 256>}, {pipeline_mode = #tpu.pipeline_mode<synchronous>, transform_indices = @transform_1, window_bounds = array<i64: 8, 256>}, {pipeline_mode = #tpu.pipeline_mode<synchronous>, transform_indices = @transform_2, window_bounds = array<i64: 1, 256>}, {pipeline_mode = #tpu.pipeline_mode<synchronous>, transform_indices = @transform_3, window_bounds = array<i64: 1, 256>}, {transform_indices = @transform_4, window_bounds = array<i64: 2>}]} {
    %c0 = arith.constant 0 : index
    %c0_0 = arith.constant 0 : index
    %0 = vector.load %arg1[%c0, %c0_0] : memref<8x256xf32, #tpu.memory_space<vmem>>, vector<8x256xf32>
    %c0_1 = arith.constant 0 : index
    %c0_2 = arith.constant 0 : index
    %1 = vector.load %arg2[%c0_1, %c0_2] : memref<8x256xf32, #tpu.memory_space<vmem>>, vector<8x256xf32>
    %c240_i32 = arith.constant 240 : i32
    %2 = tpu.dynamic_rotate %0 by %c240_i32 dim 1 : vector<8x256xf32>, i32 -> vector<8x256xf32>
    %3 = arith.subf %2, %0 : vector<8x256xf32>
    %c255_i32 = arith.constant 255 : i32
    %4 = tpu.dynamic_rotate %0 by %c255_i32 dim 1 : vector<8x256xf32>, i32 -> vector<8x256xf32>
    %5 = arith.subf %4, %0 : vector<8x256xf32>
    %c240_i32_3 = arith.constant 240 : i32
    %6 = tpu.dynamic_rotate %1 by %c240_i32_3 dim 1 : vector<8x256xf32>, i32 -> vector<8x256xf32>
    %7 = arith.subf %6, %1 : vector<8x256xf32>
    %c255_i32_4 = arith.constant 255 : i32
    %8 = tpu.dynamic_rotate %1 by %c255_i32_4 dim 1 : vector<8x256xf32>, i32 -> vector<8x256xf32>
    %9 = arith.subf %8, %1 : vector<8x256xf32>
    %c0_5 = arith.constant 0 : index
    %c0_6 = arith.constant 0 : index
    %10 = vector.load %arg3[%c0_5, %c0_6] : memref<1x256xf32, #tpu.memory_space<vmem>>, vector<1x256xf32>
    %c0_7 = arith.constant 0 : index
    %c0_8 = arith.constant 0 : index
    %11 = vector.load %arg4[%c0_7, %c0_8] : memref<1x256xf32, #tpu.memory_space<vmem>>, vector<1x256xf32>
    %c0_i32 = arith.constant 0 : i32
    %12 = arith.cmpi eq, %arg0, %c0_i32 : i32
    %13 = arith.extui %12 : i1 to i32
    %c0_i32_9 = arith.constant 0 : i32
    %14 = arith.cmpi ne, %13, %c0_i32_9 : i32
    scf.if %14 {
      %18 = math.absf %3 : vector<8x256xf32>
      %cst = arith.constant dense<0.000000e+00> : vector<256xf32>
      %19 = vector.multi_reduction <add>, %18, %cst [0] : vector<8x256xf32> to vector<256xf32>
      %20 = vector.shape_cast %19 : vector<256xf32> to vector<1x256xf32>
      %21 = arith.mulf %20, %10 : vector<1x256xf32>
      %22 = vector.shape_cast %21 : vector<1x256xf32> to vector<1x1x256xf32>
      %cst_11 = arith.constant dense<0.000000e+00> : vector<1xf32>
      %23 = vector.multi_reduction <add>, %22, %cst_11 [1, 2] : vector<1x1x256xf32> to vector<1xf32>
      %24 = vector.shape_cast %23 : vector<1xf32> to vector<1x1x1xf32>
      %25 = vector.extract %24[0, 0, 0] : f32 from vector<1x1x1xf32>
      %c0_12 = arith.constant 0 : index
      %26 = memref.load %arg6[%c0_12] : memref<4xf32, #tpu.memory_space<smem>>
      memref.store %25, %arg6[%c0_12] : memref<4xf32, #tpu.memory_space<smem>>
      %27 = math.absf %7 : vector<8x256xf32>
      %cst_13 = arith.constant dense<0.000000e+00> : vector<256xf32>
      %28 = vector.multi_reduction <add>, %27, %cst_13 [0] : vector<8x256xf32> to vector<256xf32>
      %29 = vector.shape_cast %28 : vector<256xf32> to vector<1x256xf32>
      %30 = arith.mulf %29, %10 : vector<1x256xf32>
      %31 = vector.shape_cast %30 : vector<1x256xf32> to vector<1x1x256xf32>
      %cst_14 = arith.constant dense<0.000000e+00> : vector<1xf32>
      %32 = vector.multi_reduction <add>, %31, %cst_14 [1, 2] : vector<1x1x256xf32> to vector<1xf32>
      %33 = vector.shape_cast %32 : vector<1xf32> to vector<1x1x1xf32>
      %34 = vector.extract %33[0, 0, 0] : f32 from vector<1x1x1xf32>
      %c1 = arith.constant 1 : index
      %35 = memref.load %arg6[%c1] : memref<4xf32, #tpu.memory_space<smem>>
      memref.store %34, %arg6[%c1] : memref<4xf32, #tpu.memory_space<smem>>
      %36 = math.absf %5 : vector<8x256xf32>
      %cst_15 = arith.constant dense<0.000000e+00> : vector<256xf32>
      %37 = vector.multi_reduction <add>, %36, %cst_15 [0] : vector<8x256xf32> to vector<256xf32>
      %38 = vector.shape_cast %37 : vector<256xf32> to vector<1x256xf32>
      %39 = arith.mulf %38, %11 : vector<1x256xf32>
      %40 = vector.shape_cast %39 : vector<1x256xf32> to vector<1x1x256xf32>
      %cst_16 = arith.constant dense<0.000000e+00> : vector<1xf32>
      %41 = vector.multi_reduction <add>, %40, %cst_16 [1, 2] : vector<1x1x256xf32> to vector<1xf32>
      %42 = vector.shape_cast %41 : vector<1xf32> to vector<1x1x1xf32>
      %43 = vector.extract %42[0, 0, 0] : f32 from vector<1x1x1xf32>
      %c2 = arith.constant 2 : index
      %44 = memref.load %arg6[%c2] : memref<4xf32, #tpu.memory_space<smem>>
      memref.store %43, %arg6[%c2] : memref<4xf32, #tpu.memory_space<smem>>
      %45 = math.absf %9 : vector<8x256xf32>
      %cst_17 = arith.constant dense<0.000000e+00> : vector<256xf32>
      %46 = vector.multi_reduction <add>, %45, %cst_17 [0] : vector<8x256xf32> to vector<256xf32>
      %47 = vector.shape_cast %46 : vector<256xf32> to vector<1x256xf32>
      %48 = arith.mulf %47, %11 : vector<1x256xf32>
      %49 = vector.shape_cast %48 : vector<1x256xf32> to vector<1x1x256xf32>
      %cst_18 = arith.constant dense<0.000000e+00> : vector<1xf32>
      %50 = vector.multi_reduction <add>, %49, %cst_18 [1, 2] : vector<1x1x256xf32> to vector<1xf32>
      %51 = vector.shape_cast %50 : vector<1xf32> to vector<1x1x1xf32>
      %52 = vector.extract %51[0, 0, 0] : f32 from vector<1x1x1xf32>
      %c3 = arith.constant 3 : index
      %53 = memref.load %arg6[%c3] : memref<4xf32, #tpu.memory_space<smem>>
      memref.store %52, %arg6[%c3] : memref<4xf32, #tpu.memory_space<smem>>
    } else {
    }
    %c1_i32 = arith.constant 1 : i32
    %15 = arith.cmpi eq, %arg0, %c1_i32 : i32
    %16 = arith.extui %15 : i1 to i32
    %c0_i32_10 = arith.constant 0 : i32
    %17 = arith.cmpi ne, %16, %c0_i32_10 : i32
    scf.if %17 {
      %c0_11 = arith.constant 0 : index
      %18 = memref.load %arg6[%c0_11] : memref<4xf32, #tpu.memory_space<smem>>
      %cst = arith.constant 2.000000e+00 : f32
      %19 = arith.mulf %cst, %18 : f32
      %c1 = arith.constant 1 : index
      %20 = memref.load %arg6[%c1] : memref<4xf32, #tpu.memory_space<smem>>
      %21 = arith.divf %19, %20 : f32
      %c2 = arith.constant 2 : index
      %22 = memref.load %arg6[%c2] : memref<4xf32, #tpu.memory_space<smem>>
      %cst_12 = arith.constant 2.000000e+00 : f32
      %23 = arith.mulf %cst_12, %22 : f32
      %c3 = arith.constant 3 : index
      %24 = memref.load %arg6[%c3] : memref<4xf32, #tpu.memory_space<smem>>
      %25 = arith.divf %23, %24 : f32
      %cst_13 = arith.constant 5.000000e-01 : f32
      %26 = vector.broadcast %cst_13 : f32 to vector<8x256xf32>
      %27 = arith.mulf %3, %26 : vector<8x256xf32>
      %28 = math.tanh %27 : vector<8x256xf32>
      %29 = vector.broadcast %10 : vector<1x256xf32> to vector<8x256xf32>
      %30 = arith.mulf %28, %29 : vector<8x256xf32>
      %cst_14 = arith.constant 5.000000e-01 : f32
      %31 = vector.broadcast %cst_14 : f32 to vector<8x256xf32>
      %32 = arith.mulf %5, %31 : vector<8x256xf32>
      %33 = math.tanh %32 : vector<8x256xf32>
      %34 = vector.broadcast %11 : vector<1x256xf32> to vector<8x256xf32>
      %35 = arith.mulf %33, %34 : vector<8x256xf32>
      %cst_15 = arith.constant 5.000000e-01 : f32
      %36 = arith.mulf %cst_15, %21 : f32
      %37 = vector.broadcast %36 : f32 to vector<8x256xf32>
      %38 = arith.mulf %7, %37 : vector<8x256xf32>
      %39 = math.tanh %38 : vector<8x256xf32>
      %cst_16 = arith.constant 5.000000e-01 : f32
      %40 = arith.mulf %cst_16, %25 : f32
      %41 = vector.broadcast %40 : f32 to vector<8x256xf32>
      %42 = arith.mulf %9, %41 : vector<8x256xf32>
      %43 = math.tanh %42 : vector<8x256xf32>
      %44 = arith.mulf %30, %30 : vector<8x256xf32>
      %45 = arith.mulf %39, %39 : vector<8x256xf32>
      %46 = arith.mulf %44, %45 : vector<8x256xf32>
      %47 = vector.shape_cast %46 : vector<8x256xf32> to vector<1x8x256xf32>
      %cst_17 = arith.constant dense<0.000000e+00> : vector<1xf32>
      %48 = vector.multi_reduction <add>, %47, %cst_17 [1, 2] : vector<1x8x256xf32> to vector<1xf32>
      %49 = vector.shape_cast %48 : vector<1xf32> to vector<1x1x1xf32>
      %50 = vector.extract %49[0, 0, 0] : f32 from vector<1x1x1xf32>
      %cst_18 = arith.constant 5.2083336E-4 : f32
      %51 = arith.mulf %50, %cst_18 : f32
      %52 = math.sqrt %51 : f32
      %53 = math.sqrt %52 : f32
      %c0_19 = arith.constant 0 : index
      %54 = memref.load %arg5[%c0_19] : memref<2xf32, #tpu.memory_space<smem>>
      memref.store %53, %arg5[%c0_19] : memref<2xf32, #tpu.memory_space<smem>>
      %55 = arith.mulf %35, %35 : vector<8x256xf32>
      %56 = arith.mulf %43, %43 : vector<8x256xf32>
      %57 = arith.mulf %55, %56 : vector<8x256xf32>
      %58 = vector.shape_cast %57 : vector<8x256xf32> to vector<1x8x256xf32>
      %cst_20 = arith.constant dense<0.000000e+00> : vector<1xf32>
      %59 = vector.multi_reduction <add>, %58, %cst_20 [1, 2] : vector<1x8x256xf32> to vector<1xf32>
      %60 = vector.shape_cast %59 : vector<1xf32> to vector<1x1x1xf32>
      %61 = vector.extract %60[0, 0, 0] : f32 from vector<1x1x1xf32>
      %cst_21 = arith.constant 5.2083336E-4 : f32
      %62 = arith.mulf %61, %cst_21 : f32
      %63 = math.sqrt %62 : f32
      %64 = math.sqrt %63 : f32
      %c1_22 = arith.constant 1 : index
      %65 = memref.load %arg5[%c1_22] : memref<2xf32, #tpu.memory_space<smem>>
      memref.store %64, %arg5[%c1_22] : memref<2xf32, #tpu.memory_space<smem>>
    } else {
    }
    return
  }
  func.func @transform_0(%arg0: i32) -> (i32, i32) {
    %c0_i32 = arith.constant 0 : i32
    %c0_i32_0 = arith.constant 0 : i32
    %c0_i32_1 = arith.constant 0 : i32
    return %c0_i32, %c0_i32_0 : i32, i32
  }
  func.func @transform_1(%arg0: i32) -> (i32, i32) {
    %c0_i32 = arith.constant 0 : i32
    %c0_i32_0 = arith.constant 0 : i32
    %c0_i32_1 = arith.constant 0 : i32
    return %c0_i32, %c0_i32_0 : i32, i32
  }
  func.func @transform_2(%arg0: i32) -> (i32, i32) {
    %c0_i32 = arith.constant 0 : i32
    %c0_i32_0 = arith.constant 0 : i32
    %c0_i32_1 = arith.constant 0 : i32
    return %c0_i32, %c0_i32_0 : i32, i32
  }
  func.func @transform_3(%arg0: i32) -> (i32, i32) {
    %c0_i32 = arith.constant 0 : i32
    %c0_i32_0 = arith.constant 0 : i32
    %c0_i32_1 = arith.constant 0 : i32
    return %c0_i32, %c0_i32_0 : i32, i32
  }
  func.func @transform_4(%arg0: i32) -> i32 {
    %c0_i32 = arith.constant 0 : i32
    %c0_i32_0 = arith.constant 0 : i32
    return %c0_i32 : i32
  }
}

</mosaic_0001>

<bundles_post_ra>
// kernel: exclusion_loss.1
= control target key start
LH: loop header
LB: loop body
LE: loop exit
PB: predicated region body
PF: predicated region fallthrough
CT: control target
= control target key end

     0   :  { %9 = vsyncpa [#allocation4], 0  ;;  %s661_s15 = smov 0   ;;  %s765_s0 = inlined_call_operand.vmem [shape: f32[8,256], index: 0, kind: input, shape index: {}]   ;;  %s766_s1 = inlined_call_operand.vmem [shape: f32[8,256], index: 1, kind: input, shape index: {}]   ;;  %s767_s2 = inlined_call_operand.vmem [shape: f32[1,256], index: 2, kind: input, shape index: {}]   ;;  %s768_s3 = inlined_call_operand.vmem [shape: f32[1,256], index: 3, kind: input, shape index: {}]   ;;  %s769_s4 = inlined_call_operand.vmem [shape: f32[2], index: 4, kind: output, shape index: {}]  }
   0x1 LB: > { %s667_s16 = sadd.s32 4294967295, %s631_s15   ;;  %p528_p0 = scmp.ge.s32.totalorder %s631_s15, 1  ;;  %s631_s15 = sphi %s661_s15, %s15_s15  }
   0x2   : > { %p148_p1 = scmp.lt.s32.totalorder %s631_s15, 3 }
   0x4   : > { %p149_p2 = pnand %p528_p0, %p148_p1 }
   0x5   : > { %v164_v0 = vld [vmem:[%s765_s0] sm:$0xff] (!%p149_p2)  ;;  %s633_s19 = smov (!%p149_p2), 127   ;;  %s634_s20 = smov (!%p149_p2), 112   ;;  %v165_v2 = vld [vmem:[%s765_s0 + $0x8] sm:$0xff] (!%p149_p2)  ;;  %v172_v6 = vlaneseq (!%p149_p2) }
   0x6   : > { %152 = sbr.rel (%p149_p2) target bundleno = 946 (0x3b2), region = 36  ;;  %179 = vrot.lane.b32.xlu1 (!%p149_p2), %v164_v0, %s633_s19  ;;  %168 = vrot.lane.b32.xlu0 (!%p149_p2), %v164_v0, %s634_s20  ;;  %v677_v1 = vld [vmem:[%s767_s2] sm:$0x3] (!%p149_p2)  ;;  %v167_v4 = vld [vmem:[%s766_s1 + $0x8] sm:$0xff] (!%p149_p2)  ;;  %p529_p3 = scmp.ne.s32.totalorder (!%p149_p2), %s667_s16, 0 }
   0x7   : > { %v685_v3 = vld [vmem:[%s768_s3] sm:$0x3] (!%p149_p2)  ;;  %v173_v7 = vand.u32 (!%p149_p2), 127, %v172_v6 }
   0x8   : > { %v166_v5 = vld [vmem:[%s766_s1] sm:$0xff] (!%p149_p2) }
   0x9   : > { %vm183_vm0 = vcmp.lt.s32.totalorder (!%p149_p2), %v173_v7, 127  ;;  %vm174_vm1 = vcmp.lt.s32.totalorder (!%p149_p2), %v173_v7, 112 }
   0xa   : > { %181 = vrot.lane.b32.xlu1 (!%p149_p2), %v165_v2, %s633_s19  ;;  %170 = vrot.lane.b32.xlu0 (!%p149_p2), %v165_v2, %s634_s20 }
   0xd   : > { %v226_v32 = vshrl.u32 (!%p529_p3), %v172_v6, 7  ;;  %vm237_vm2 = vcmask (!%p529_p3), 1040384  }
   0xe   : > { %190 = vrot.lane.b32.xlu1 %v167_v4, %s634_s20  ;;  %188 = vrot.lane.b32.xlu0 %v166_v5, %s634_s20 }
   0xf   : > { %v227_v38 = vsub.s32 (!%p529_p3), 0, %v226_v32  ;;  %v231_v39 = vsub.s32 (!%p529_p3), 1, %v226_v32 }
  0x11   : > { %v300_v48 = vrot.slane (!%p529_p3), %v685_v3, %v227_v38  ;;  %v304_v49 = vrot.slane (!%p529_p3), %v685_v3, %v231_v39  ;;  %v228_v52 = vrot.slane (!%p529_p3), %v677_v1, %v227_v38  ;;  %v232_v53 = vrot.slane (!%p529_p3), %v677_v1, %v231_v39 }
  0x12   : > { %198 = vrot.lane.b32.xlu1 %v167_v4, %s633_s19  ;;  %196 = vrot.lane.b32.xlu0 %v166_v5, %s633_s19 }
  0x78   : > { %v180_v8 = vpop.permute.xlu1 %179  ;;  %v169_v9 = vpop.permute.xlu0 %168 }
  0x7c   : > { %v182_v10 = vpop.permute.xlu1 %181  ;;  %v171_v11 = vpop.permute.xlu0 %170 }
  0x7d   : > { %v184_v12 = vsel %vm183_vm0, %v180_v8, %v182_v10  ;;  %v185_v13 = vsel %vm183_vm0, %v182_v10, %v180_v8  ;;  %v175_v14 = vsel %vm174_vm1, %v169_v9, %v171_v11  ;;  %v176_v15 = vsel %vm174_vm1, %v171_v11, %v169_v9 }
  0x7e   : > { %v696_v16 = vsub.f32 %v184_v12, %v164_v0  ;;  %v698_v17 = vsub.f32 %v185_v13, %v165_v2  ;;  %v700_v18 = vsub.f32 %v175_v14, %v164_v0  ;;  %v702_v19 = vsub.f32 %v176_v15, %v165_v2 }
  0x80   : > { %v191_v20 = vpop.permute.xlu1 %190  ;;  %v189_v21 = vpop.permute.xlu0 %188  ;;  %209 = sbr.rel (%p529_p3) target bundleno = 362 (0x16a), region = 40  ;;  %v282_v33 = vand.u32 (!%p529_p3), 2147483647, %v696_v16  ;;  %v283_v34 = vand.u32 (!%p529_p3), 2147483647, %v698_v17 }
  0x81   : > { %v192_v22 = vsel %vm174_vm1, %v189_v21, %v191_v20  ;;  %v193_v23 = vsel %vm174_vm1, %v191_v20, %v189_v21  ;;  %v210_v35 = vand.u32 (!%p529_p3), 2147483647, %v700_v18  ;;  %v211_v36 = vand.u32 (!%p529_p3), 2147483647, %v702_v19 }
  0x82   : > { %v704_v24 = vsub.f32 %v192_v22, %v166_v5  ;;  %v706_v25 = vsub.f32 %v193_v23, %v167_v4  ;;  %v284_v40 = vrot.slane (!%p529_p3), %v282_v33, 4  ;;  %v290_v41 = vrot.slane (!%p529_p3), %v283_v34, 4 }
  0x83   : > { %v212_v42 = vrot.slane (!%p529_p3), %v210_v35, 4  ;;  %v218_v43 = vrot.slane (!%p529_p3), %v211_v36, 4 }
  0x84   : > { %v199_v26 = vpop.permute.xlu1 %198  ;;  %v197_v27 = vpop.permute.xlu0 %196  ;;  %v285_v46 = vadd.f32 (!%p529_p3), %v284_v40, %v282_v33  ;;  %v291_v47 = vadd.f32 (!%p529_p3), %v290_v41, %v283_v34  ;;  %v252_v60 = vand.u32 (!%p529_p3), 2147483647, %v704_v24  ;;  %v253_v61 = vand.u32 (!%p529_p3), 2147483647, %v706_v25 }
  0x85   : > { %v200_v28 = vsel %vm183_vm0, %v197_v27, %v199_v26  ;;  %v201_v29 = vsel %vm183_vm0, %v199_v26, %v197_v27  ;;  %v213_v50 = vadd.f32 (!%p529_p3), %v212_v42, %v210_v35  ;;  %v219_v51 = vadd.f32 (!%p529_p3), %v218_v43, %v211_v36 }
  0x86   : > { %v710_v30 = vsub.f32 %v200_v28, %v166_v5  ;;  %v712_v31 = vsub.f32 %v201_v29, %v167_v4  ;;  %v286_v54 = vrot.slane (!%p529_p3), %v285_v46, 2  ;;  %v292_v55 = vrot.slane (!%p529_p3), %v291_v47, 2 }
  0x87   : > { %v214_v58 = vrot.slane %v213_v50, 2  ;;  %v220_v59 = vrot.slane %v219_v51, 2  ;;  %v254_v7 = vrot.slane %v252_v60, 4  ;;  %v260_v8 = vrot.slane %v253_v61, 4 }
  0x88   : > { %v323_v37 = vand.u32 2147483647, %v710_v30  ;;  %v324_v44 = vand.u32 2147483647, %v712_v31  ;;  %v287_v62 = vadd.f32 %v286_v54, %v285_v46  ;;  %v293_v63 = vadd.f32 %v292_v55, %v291_v47 }
  0x89   : > { %v215_v4 = vadd.f32 %v214_v58, %v213_v50  ;;  %v221_v5 = vadd.f32 %v220_v59, %v219_v51  ;;  %v255_v15 = vadd.f32 %v254_v7, %v252_v60  ;;  %v261_v20 = vadd.f32 %v260_v8, %v253_v61 }
  0x8a   : > { %v325_v45 = vrot.slane %v323_v37, 4  ;;  %v331_v57 = vrot.slane %v324_v44, 4  ;;  %v288_v9 = vrot.slane %v287_v62, 1  ;;  %v294_v10 = vrot.slane %v293_v63, 1 }
  0x8b   : > { %v216_v13 = vrot.slane %v215_v4, 1  ;;  %v222_v14 = vrot.slane %v221_v5, 1  ;;  %v256_v29 = vrot.slane %v255_v15, 2  ;;  %v262_v32 = vrot.slane %v261_v20, 2 }
  0x8c   : > { %v326_v56 = vadd.f32 %v325_v45, %v323_v37  ;;  %v332_v2 = vadd.f32 %v331_v57, %v324_v44  ;;  %v289_v21 = vadd.f32 %v288_v9, %v287_v62  ;;  %v295_v22 = vadd.f32 %v294_v10, %v293_v63 }
  0x8d   : > { %v217_v27 = vadd.f32 %v216_v13, %v215_v4  ;;  %v223_v28 = vadd.f32 %v222_v14, %v221_v5  ;;  %v257_v39 = vadd.f32 %v256_v29, %v255_v15  ;;  %v263_v40 = vadd.f32 %v262_v32, %v261_v20 }
  0x8e   : > { %v327_v0 = vrot.slane %v326_v56, 2  ;;  %v333_v12 = vrot.slane %v332_v2, 2  ;;  %v307_v33 = vmul.f32 %v300_v48, %v289_v21  ;;  %v308_v34 = vmul.f32 %v304_v49, %v295_v22 }
  0x8f   : > { %v235_v37 = vmul.f32 %v228_v52, %v217_v27  ;;  %v236_v38 = vmul.f32 %v232_v53, %v223_v28  ;;  %v258_v50 = vrot.slane %v257_v39, 1 }
  0x90   : > { %v328_v11 = vadd.f32 %v327_v0, %v326_v56  ;;  %v334_v26 = vadd.f32 %v333_v12, %v332_v2  ;;  %v309_v41 = vsel %vm237_vm2, %v307_v33, 0.0  ;;  %v310_v42 = vsel %vm237_vm2, %v308_v34, 0.0 }
  0x91   : > { %v311_v45 = vadd.f32 %v310_v42, %v309_v41  ;;  %v238_v46 = vsel %vm237_vm2, %v235_v37, 0.0  ;;  %v239_v47 = vsel %vm237_vm2, %v236_v38, 0.0  ;;  %v264_v56 = vrot.slane %v263_v40, 1 }
  0x92   : > { %v329_v23 = vrot.slane %v328_v11, 1  ;;  %v335_v36 = vrot.slane %v334_v26, 1  ;;  %v240_v51 = vadd.f32 %v239_v47, %v238_v46  ;;  %v259_v57 = vadd.f32 %v258_v50, %v257_v39 }
  0x93   : > { %312 = vadd.xlane.f32.xlu1 %v311_v45  ;;  %v265_v59 = vadd.f32 %v264_v56, %v263_v40 }
  0x94   : > { %v330_v35 = vadd.f32 %v329_v23, %v328_v11  ;;  %v336_v43 = vadd.f32 %v335_v36, %v334_v26  ;;  %241 = vadd.xlane.f32.xlu0 %v240_v51  ;;  %v266_v61 = vmul.f32 %v259_v57, %v228_v52 }
  0x96   : > { %v337_v44 = vmul.f32 %v330_v35, %v300_v48  ;;  %v338_v54 = vmul.f32 %v336_v43, %v304_v49  ;;  %v267_v48 = vmul.f32 %v265_v59, %v232_v53  ;;  %v268_v62 = vsel %vm237_vm2, %v266_v61, 0.0 }
  0x98   : > { %v339_v55 = vsel %vm237_vm2, %v337_v44, 0.0  ;;  %v340_v58 = vsel %vm237_vm2, %v338_v54, 0.0  ;;  %v269_v63 = vsel %vm237_vm2, %v267_v48, 0.0 }
  0x99   : > { %v341_v60 = vadd.f32 %v340_v58, %v339_v55  ;;  %v270_v0 = vadd.f32 %v269_v63, %v268_v62 }
  0x9b   : > { %342 = vadd.xlane.f32.xlu1 %v341_v60  ;;  %271 = vadd.xlane.f32.xlu0 %v270_v0 }
 0x120   : > { %v313_v49 = vpop.xlane.xlu1 %312 }
 0x121   : > { %v314_v2 = vrot.slane %v313_v49, 4  ;;  %v242_v4 = vpop.xlane.xlu0 %241 }
 0x122   : > { %v243_v5 = vrot.slane %v242_v4, 4 }
 0x123   : > { %v315_v7 = vadd.f32 %v314_v2, %v313_v49 }
 0x124   : > { %v244_v8 = vadd.f32 %v243_v5, %v242_v4 }
 0x125   : > { %v316_v13 = vrot.slane %v315_v7, 2 }
 0x126   : > { %v245_v11 = vrot.slane %v244_v8, 2 }
 0x127   : > { %v317_v26 = vadd.f32 %v316_v13, %v315_v7 }
 0x128   : > { %v343_v9 = vpop.xlane.xlu1 %342  ;;  %v272_v52 = vpop.xlane.xlu0 %271  ;;  %v246_v53 = vadd.f32 %v245_v11, %v244_v8 }
 0x129   : > { %v344_v10 = vrot.slane %v343_v9, 4  ;;  %v273_v15 = vrot.slane %v272_v52, 4  ;;  %v318_v32 = vrot.slane %v317_v26, 1 }
 0x12a   : > { %v247_v20 = vrot.slane %v246_v53, 1 }
 0x12b   : > { %v345_v12 = vadd.f32 %v344_v10, %v343_v9  ;;  %v274_v22 = vadd.f32 %v273_v15, %v272_v52  ;;  %v319_v36 = vadd.f32 %v318_v32, %v317_v26 }
 0x12c   : > { %v248_v23 = vadd.f32 %v247_v20, %v246_v53 }
 0x12d   : > { %v346_v14 = vrot.slane %v345_v12, 2  ;;  %v275_v27 = vrot.slane %v274_v22, 2 }
 0x12e   : > { %538 = vpush %v248_v23 }
 0x12f   : > { %v347_v21 = vadd.f32 %v346_v14, %v345_v12  ;;  %v276_v28 = vadd.f32 %v275_v27, %v274_v22 }
 0x131   : > { %v348_v29 = vrot.slane %v347_v21, 1  ;;  %v277_v33 = vrot.slane %v276_v28, 1 }
 0x133   : > { %v278_v34 = vadd.f32 %v277_v33, %v276_v28  ;;  %v349_v35 = vadd.f32 %v348_v29, %v347_v21 }
 0x135   : > { %540 = vpush %v278_v34 }
 0x136   : > { %542 = vpush %v319_v36 }
 0x137   : > { %544 = vpush %v349_v35 }
 0x15f   : > { %s539_s5 = spop %538 }
 0x160   : > { %251 = sst [smem:[#allocation2]] %s539_s5 }
 0x166   : > { %s541_s6 = spop %540 }
 0x167   : > { %281 = sst [smem:[#allocation2 + $0x1]] %s541_s6  ;;  %s543_s7 = spop %542 }
 0x168   : > { %322 = sst [smem:[#allocation2 + $0x2]] %s543_s7  ;;  %s545_s8 = spop %544 }
 0x169   : > { %352 = sst [smem:[#allocation2 + $0x3]] %s545_s8 }
 0x16a PF: > { %p530_p4 = scmp.ne.s32.totalorder %s667_s16, 1 }
 0x16b   : > { %s531_s9 = sld [smem:[#allocation2 + $0x1]] (!%p530_p4)  ;;  %s533_s10 = sld [smem:[#allocation2 + $0x3]] (!%p530_p4)  ;;  %v371_v41 = vmul.f32 (!%p530_p4), 0.5, %v700_v18  ;;  %v372_v42 = vmul.f32 (!%p530_p4), 0.5, %v702_v19  ;;  %v388_v43 = vmul.f32 (!%p530_p4), 0.5, %v696_v16  ;;  %v389_v44 = vmul.f32 (!%p530_p4), 0.5, %v698_v17 }
 0x16c   : > { %356 = sbr.rel (%p530_p4) target bundleno = 930 (0x3a2), region = 44  ;;  %s357_s11 = sld [smem:[#allocation2]] (!%p530_p4)  ;;  %v377_v45 = vshrl.u32 (!%p530_p4), %v172_v6, 7 }
 0x16d   : > { %s532_s12 = sld [smem:[#allocation2 + $0x2]] (!%p530_p4) }
 0x16e   : > { %v378_v46 = vsub.s32 (!%p530_p4), 0, %v377_v45  ;;  %v382_v47 = vsub.s32 (!%p530_p4), 1, %v377_v45 }
 0x170   : > { %v379_v6 = vrot.slane (!%p530_p4), %v677_v1, %v378_v46  ;;  %v383_v55 = vrot.slane (!%p530_p4), %v677_v1, %v382_v47 }
 0x171   : > { %v360_v37 = vstv (!%p530_p4), %s531_s9  ;;  %v367_v38 = vstv (!%p530_p4), %s533_s10 }
 0x172   : > { %579 = vrcp.f32 (!%p530_p4), %v360_v37  ;;  %s358_s13 = smul.f32 (!%p530_p4), 2.0, %s357_s11 }
 0x173   : > { %581 = vrcp.f32 %v367_v38  ;;  %s365_s14 = smul.f32 2.0, %s532_s12 }
 0x174   : > { %583 = vtanh.f32 %v371_v41 }
 0x175   : > { %585 = vtanh.f32 %v372_v42 }
 0x176   : > { %587 = vtanh.f32 %v388_v43 }
 0x177   : > { %589 = vtanh.f32 %v389_v44 }
 0x17c   : > { %v580_v39 = vpop.eup %579 }
 0x17d   : > { %v582_v40 = vpop.eup %581  ;;  %546 = vpush %v580_v39 }
 0x17e   : > { %548 = vpush %v582_v40  ;;  %v584_v54 = vpop.eup %583 }
 0x17f   : > { %v586_v56 = vpop.eup %585  ;;  %v386_v59 = vmul.f32 %v584_v54, %v379_v6 }
 0x180   : > { %v588_v57 = vpop.eup %587 }
 0x181   : > { %v590_v58 = vpop.eup %589  ;;  %v417_v61 = vmul.f32 %v386_v59, %v386_v59 }
 0x1ae   : > { %s547_s17 = spop %546 }
 0x1af   : > { %s363_s18 = smul.f32 %s547_s17, %s358_s13  ;;  %s549_s19 = spop %548 }
 0x1b0   : > { %s370_s20 = smul.f32 %s549_s19, %s365_s14 }
 0x1b1   : > { %s405_s21 = smul.f32 0.5, %s363_s18 }
 0x1b2   : > { %s411_s22 = smul.f32 0.5, %s370_s20 }
 0x1b3   : > { %v406_v18 = vstv %s405_s21 }
 0x1b4   : > { %v407_v19 = vmul.f32 %v406_v18, %v704_v24  ;;  %v408_v16 = vmul.f32 %v406_v18, %v706_v25  ;;  %v412_v17 = vstv %s411_s22  ;;  %v396_v24 = vrot.slane %v685_v3, %v378_v46 }
 0x1b5   : > { %v413_v50 = vmul.f32 %v412_v17, %v710_v30  ;;  %v414_v51 = vmul.f32 %v412_v17, %v712_v31  ;;  %v400_v25 = vrot.slane %v685_v3, %v382_v47  ;;  %v387_v30 = vmul.f32 %v586_v56, %v383_v55 }
 0x1b6   : > { %591 = vtanh.f32 %v407_v19  ;;  %v403_v60 = vmul.f32 %v588_v57, %v396_v24 }
 0x1b7   : > { %593 = vtanh.f32 %v408_v16  ;;  %v404_v31 = vmul.f32 %v590_v58, %v400_v25  ;;  %v418_v62 = vmul.f32 %v387_v30, %v387_v30 }
 0x1b8   : > { %595 = vtanh.f32 %v413_v50  ;;  %v454_v49 = vmul.f32 %v403_v60, %v403_v60 }
 0x1b9   : > { %597 = vtanh.f32 %v414_v51  ;;  %v455_v4 = vmul.f32 %v404_v31, %v404_v31 }
 0x1c0   : > { %v592_v48 = vpop.eup %591 }
 0x1c1   : > { %v594_v63 = vpop.eup %593  ;;  %v419_v0 = vmul.f32 %v592_v48, %v592_v48 }
 0x1c2   : > { %v596_v1 = vpop.eup %595  ;;  %v420_v2 = vmul.f32 %v594_v63, %v594_v63 }
 0x1c3   : > { %v598_v5 = vpop.eup %597  ;;  %v421_v7 = vmul.f32 %v419_v0, %v417_v61  ;;  %v456_v8 = vmul.f32 %v596_v1, %v596_v1 }
 0x1c4   : > { %v422_v9 = vmul.f32 %v420_v2, %v418_v62  ;;  %v457_v10 = vmul.f32 %v598_v5, %v598_v5 }
 0x1c5   : > { %v458_v3 = vmul.f32 %v456_v8, %v454_v49 }
 0x1c6   : > { %v423_v11 = vadd.f32 %v422_v9, %v421_v7  ;;  %v459_v12 = vmul.f32 %v457_v10, %v455_v4 }
 0x1c8   : > { %424 = vadd.xlane.f32.xlu0 %v423_v11  ;;  %v460_v13 = vadd.f32 %v459_v12, %v458_v3 }
 0x1cc   : > { %461 = vadd.xlane.f32.xlu0 %v460_v13 }
 0x255   : > { %v425_v52 = vpop.xlane.xlu0 %424 }
 0x256   : > { %v426_v53 = vrot.slane %v425_v52, 4 }
 0x258   : > { %v427_v14 = vadd.f32 %v426_v53, %v425_v52 }
 0x259   : > { %v462_v33 = vpop.xlane.xlu0 %461 }
 0x25a   : > { %v428_v15 = vrot.slane %v427_v14, 2  ;;  %v463_v34 = vrot.slane %v462_v33, 4 }
 0x25c   : > { %v429_v20 = vadd.f32 %v428_v15, %v427_v14  ;;  %v464_v35 = vadd.f32 %v463_v34, %v462_v33 }
 0x25e   : > { %v430_v21 = vrot.slane %v429_v20, 1  ;;  %v465_v37 = vrot.slane %v464_v35, 2 }
 0x260   : > { %v431_v22 = vadd.f32 %v430_v21, %v429_v20  ;;  %v466_v38 = vadd.f32 %v465_v37, %v464_v35 }
 0x262   : > { %550 = vpush %v431_v22  ;;  %v467_v40 = vrot.slane %v466_v38, 1 }
 0x264   : > { %v468_v45 = vadd.f32 %v467_v40, %v466_v38 }
 0x293   : > { %s551_s23 = spop %550 }
 0x294   : > { %s433_s24 = smul.f32 0.00052083336, %s551_s23 }
 0x296   : > { %v434_v23 = vstv %s433_s24 }
 0x297   : > { %599 = vrsqrt.f32 %v434_v23  ;;  %vm437_vm3 = vcmp.eq.f32.partialorder %v434_v23, inf  ;;  %v440_v28 = vand.u32 2147483648, %v434_v23  ;;  %vm439_vm4 = vcmp.eq.f32.partialorder %v434_v23, 0.0 }
 0x2a1   : > { %v600_v26 = vpop.eup %599 }
 0x2a2   : > { %v436_v27 = vmul.f32 %v600_v26, %v434_v23 }
 0x2a4   : > { %v438_v29 = vsel %vm437_vm3, %v434_v23, %v436_v27 }
 0x2a5   : > { %v441_v32 = vsel %vm439_vm4, %v440_v28, %v438_v29 }
 0x2a6   : > { %552 = vpush %v441_v32 }
 0x2d7   : > { %s553_s25 = spop %552 }
 0x2d8   : > { %v443_v36 = vstv %s553_s25 }
 0x2d9   : > { %601 = vrsqrt.f32 %v443_v36  ;;  %vm446_vm5 = vcmp.eq.f32.partialorder %v443_v36, inf  ;;  %v449_v42 = vand.u32 2147483648, %v443_v36  ;;  %vm448_vm6 = vcmp.eq.f32.partialorder %v443_v36, 0.0 }
 0x2e3   : > { %v602_v39 = vpop.eup %601 }
 0x2e4   : > { %v445_v41 = vmul.f32 %v602_v39, %v443_v36 }
 0x2e6   : > { %v447_v43 = vsel %vm446_vm5, %v443_v36, %v445_v41 }
 0x2e7   : > { %v450_v44 = vsel %vm448_vm6, %v449_v42, %v447_v43 }
 0x2e8   : > { %554 = vpush %v450_v44 }
 0x2e9   : > { %556 = vpush %v468_v45 }
 0x319   : > { %s555_s26 = spop %554 }
 0x31a   : > { %453 = sst [smem:[#allocation3]] %s555_s26  ;;  %s557_s27 = spop %556 }
 0x31b   : > { %s470_s28 = smul.f32 0.00052083336, %s557_s27 }
 0x31d   : > { %v471_v18 = vstv %s470_s28 }
 0x31e   : > { %603 = vrsqrt.f32 %v471_v18  ;;  %vm474_vm7 = vcmp.eq.f32.partialorder %v471_v18, inf  ;;  %v477_v16 = vand.u32 2147483648, %v471_v18  ;;  %vm476_vm8 = vcmp.eq.f32.partialorder %v471_v18, 0.0 }
 0x328   : > { %v604_v46 = vpop.eup %603 }
 0x329   : > { %v473_v19 = vmul.f32 %v604_v46, %v471_v18 }
 0x32b   : > { %v475_v47 = vsel %vm474_vm7, %v471_v18, %v473_v19 }
 0x32c   : > { %v478_v17 = vsel %vm476_vm8, %v477_v16, %v475_v47 }
 0x32d   : > { %558 = vpush %v478_v17 }
 0x35e   : > { %s559_s29 = spop %558 }
 0x35f   : > { %v480_v50 = vstv %s559_s29 }
 0x360   : > { %605 = vrsqrt.f32 %v480_v50  ;;  %vm483_vm9 = vcmp.eq.f32.partialorder %v480_v50, inf  ;;  %v486_v54 = vand.u32 2147483648, %v480_v50  ;;  %vm485_vm10 = vcmp.eq.f32.partialorder %v480_v50, 0.0 }
 0x36a   : > { %v606_v51 = vpop.eup %605 }
 0x36b   : > { %v482_v6 = vmul.f32 %v606_v51, %v480_v50 }
 0x36d   : > { %v484_v55 = vsel %vm483_vm9, %v480_v50, %v482_v6 }
 0x36e   : > { %v487_v56 = vsel %vm485_vm10, %v486_v54, %v484_v55 }
 0x36f   : > { %560 = vpush %v487_v56 }
 0x3a0   : > { %s561_s30 = spop %560 }
 0x3a1   : > { %490 = sst [smem:[#allocation3 + $0x1]] %s561_s30 }
 0x3a2 PF: > { %p566_p5 = scmp.eq.s32.totalorder %s667_s16, 1  ;;  %s498_s7 = sshll.u32 %s769_s4, 4  ;;  %s499_s7 = int_to_ptr.vmem [resolvable:$true] %s498_s7 }
 0x3a3   : > { %s607_s8 = scalar_lea.vmem %s499_s7, 16  ;;  %p614_p9 = scmp.lt.s32.totalorder %s499_s7, %s499_s7 }
 0x3a4   : > { %p608_p6 = scmp.ne.s32.totalorder %s499_s7, %s607_s8  ;;  %p615_p10 = scmp.lt.s32.totalorder %s607_s8, %s607_s8 }
 0x3a6   : > { %p609_p7 = pnand %p608_p6, %p566_p5  ;;  %p616_p11 = por %p615_p10, %p614_p9 }
 0x3a8   : > { %p610_p8 = pneg %p609_p7 }
 0x3aa   : > { %p617_p12 = pnand %p616_p11, %p610_p8 }
 0x3ac   : > { %620 = shalt.err (!%p617_p12)
}
 0x3ad   : > { %s635_s9 = smov [#allocation3]  }
 0x3ae   : > { %563 = dma.smem_to_vmem (%p566_p5), %s635_s9, 16, %s499_s7, [#allocation4]  }
 0x3af   : > { %626 = dma.done.wait (%p566_p5), [#allocation4], 16  }
 0x3b0   : > { %628 = vsyncadd (%p566_p5), [#allocation4], 4294967280 }
 0x3b1   : > { %506 = sfence }
 0x3b2 PF: > { %s15_s15 = sadd.s32 1, %s631_s15  }
 0x3b3   : > { %p12_p13 = scmp.ge.s32.totalorder %s15_s15, 4  }
 0x3b5   :  { %14 = sbr.rel (!%p12_p13) target bundleno = 1 (0x1), region = 74 }
 0x3bc   :  { %512 = vsyncpa [#allocation4], 1 }
 0x3bd   :  { %514 = vsyncpa [#allocation4 + $0x1], 1 }

</bundles_post_ra>
